<compile_context>
chip_gen: v5e
topology: v5e:2x2
jax: 0.10.0
libtpu: 0.0.40
codegen_flags: <defaults>
</compile_context>

<pallas_src>
import functools
import math

import jax
import jax.numpy as jnp
from jax.experimental import pallas as pl
from jax.experimental.pallas import tpu as pltpu


# ----------------------------------------------------------------------------
# Shared in-kernel helpers (pure jnp, traced inside the kernels)
# ----------------------------------------------------------------------------
def _ln(h, gamma, beta, eps):
    """LayerNorm over the last axis, statistics in f32."""
    mu = jnp.mean(h, axis=-1, keepdims=True)
    var = jnp.mean(jnp.square(h - mu), axis=-1, keepdims=True)
    return (h - mu) * jax.lax.rsqrt(var + eps) * gamma + beta


def _gelu(x):
    # TODO(synk): HF BERT default is exact erf-GELU; tanh approximation used here.
    return 0.5 * x * (1.0 + jnp.tanh(0.7978845608028654 * (x + 0.044715 * x * x * x)))


# ----------------------------------------------------------------------------
# Small host-side helpers: tiling, VMEM budget, single-buffered weight specs
# ----------------------------------------------------------------------------
def _pick_tile(n, cap):
    """Largest row-tile <= cap dividing n (multiple of 8 when possible)."""
    if n <= cap:
        return n
    best = None
    for t in range(8, cap + 1, 8):
        if n % t == 0:
            best = t
    return best if best is not None else n


@functools.lru_cache(maxsize=None)
def _vmem_limit():
    """~56 MiB on v7x (64 MiB physical), ~100 MiB on v5e/v6e (128 MiB)."""
    cap = 64 * 1024 * 1024
    try:
        cap = int(pltpu.get_tpu_info().vmem_capacity_bytes)
    except Exception:
        pass
    return int(min(max(cap - 8 * 1024 * 1024, 32 * 1024 * 1024), 100 * 1024 * 1024))


@functools.lru_cache(maxsize=None)
def _single_buffer_supported():
    """Probe whether pipeline_mode=pl.Buffered(1) is accepted by this JAX/Mosaic."""
    try:
        def k(x_ref, o_ref):
            o_ref[...] = x_ref[...] * 2.0

        f = pl.pallas_call(
            k,
            out_shape=jax.ShapeDtypeStruct((16, 128), jnp.float32),
            grid=(2,),
            in_specs=[pl.BlockSpec((8, 128), lambda i: (0, 0),
                                   pipeline_mode=pl.Buffered(1))],
            out_specs=pl.BlockSpec((8, 128), lambda i: (i, 0)),
        )
        jax.block_until_ready(f(jnp.ones((16, 128), jnp.float32)))
        return True
    except Exception:
        return False


def _weight_pipeline_mode():
    return pl.Buffered(1) if _single_buffer_supported() else None


def _const_spec(shape, mode):
    """BlockSpec for a grid-invariant (weight) operand; single-buffered if possible."""
    idx = lambda *_: (0,) * len(shape)  # noqa: E731  (index never changes)
    if mode is None:
        return pl.BlockSpec(shape, idx)
    return pl.BlockSpec(shape, idx, pipeline_mode=mode)


# ----------------------------------------------------------------------------
# Embedding LayerNorm kernel (no residual), large row blocks
# ----------------------------------------------------------------------------
def _ln_kernel(x_ref, g_ref, b_ref, o_ref, *, eps):
    h = x_ref[...].astype(jnp.float32)
    o_ref[...] = _ln(h, g_ref[...], b_ref[...], eps).astype(o_ref.dtype)


def layernorm(x, gamma, beta, *, out_dtype, eps=1e-12, block_rows=512):
    M, H = x.shape
    br = min(block_rows, M)
    mode = _weight_pipeline_mode()
    return pl.pallas_call(
        functools.partial(_ln_kernel, eps=eps),
        out_shape=jax.ShapeDtypeStruct((M, H), out_dtype),
        grid=(pl.cdiv(M, br),),          # partial tail block handled by Pallas masking
        in_specs=[
            pl.BlockSpec((br, H), lambda i: (i, 0)),
            _const_spec((1, H), mode),
            _const_spec((1, H), mode),
        ],
        out_specs=pl.BlockSpec((br, H), lambda i: (i, 0)),
        compiler_params=pltpu.CompilerParams(
            dimension_semantics=("parallel",),
            vmem_limit_bytes=_vmem_limit(),
        ),
    )(x, gamma.reshape(1, H), beta.reshape(1, H))


# ----------------------------------------------------------------------------
# Fused QKV projection kernel (row-tiled GEMM, bf16 out, scale folded into Q)
# ----------------------------------------------------------------------------
def _qkv_kernel(x_ref, w_ref, b_ref, o_ref):
    o_ref[...] = (jnp.dot(x_ref[...], w_ref[...],
                          preferred_element_type=jnp.float32)
                  + b_ref[...]).astype(o_ref.dtype)


def qkv_proj(x2d, wqkv, bqkv):
    M, H = x2d.shape
    N = wqkv.shape[1]
    tr = _pick_tile(M, 512)
    mode = _weight_pipeline_mode()
    return pl.pallas_call(
        _qkv_kernel,
        out_shape=jax.ShapeDtypeStruct((M, N), jnp.bfloat16),
        grid=(pl.cdiv(M, tr),),
        in_specs=[
            pl.BlockSpec((tr, H), lambda r: (r, 0)),
            _const_spec((H, N), mode),
            _const_spec((1, N), mode),
        ],
        out_specs=pl.BlockSpec((tr, N), lambda r: (r, 0)),
        compiler_params=pltpu.CompilerParams(
            dimension_semantics=("parallel",),
            vmem_limit_bytes=_vmem_limit(),
        ),
    )(x2d, wqkv, bqkv)


# ----------------------------------------------------------------------------
# Fused attention + out-proj + LN1 + FFN + LN2 kernel, grid = (batch, q-tiles)
# ----------------------------------------------------------------------------
def _attn_ffn_kernel(mask_ref, q_ref, k_ref, v_ref, x_ref,
                     wo_ref, bo_ref, ln1g_ref, ln1b_ref,
                     wi_ref, bi_ref, wo2_ref, bo2_ref,
                     ln2g_ref, ln2b_ref, o_ref, *, eps):
    S = k_ref.shape[1]
    mask = mask_ref[...].reshape(1, 1, S)            # additive key mask, f32

    q = q_ref[...]                                   # (nh, tq, dh) bf16 (pre-scaled)
    k = k_ref[...]                                   # (nh, S,  dh) bf16
    v = v_ref[...]                                   # (nh, S,  dh) bf16

    # --- head-batched attention, single contraction chain (no per-head loop)
    s = jnp.einsum('hqd,hkd->hqk', q, k,
                   preferred_element_type=jnp.float32)           # (nh, tq, S)
    s = s + mask                                      # mask before the row max
    s = s - jnp.max(s, axis=-1, keepdims=True)
    p = jnp.exp(s)
    p = p * pl.reciprocal(jnp.sum(p, axis=-1, keepdims=True), approx=True)
    ctx = jnp.einsum('hqk,hkd->hqd', p.astype(jnp.bfloat16), v,
                     preferred_element_type=jnp.float32)          # (nh, tq, dh)

    # --- output projection as a head-batched matmul summed over heads:
    #     out[q, e] = sum_h ctx[h, q, :] @ Wo[h, :, e]
    attn = jnp.einsum('hqd,hde->hqe', ctx.astype(jnp.bfloat16), wo_ref[...],
                      preferred_element_type=jnp.float32)         # (nh, tq, H)
    attn = jnp.sum(attn, axis=0) + bo_ref[...]                    # (tq, H) f32

    x_rows = x_ref[...].astype(jnp.float32)                       # residual
    h1 = _ln(attn + x_rows, ln1g_ref[...], ln1b_ref[...], eps)    # (tq, H) f32

    # --- FFN + residual + LayerNorm
    inter = jnp.dot(h1.astype(jnp.bfloat16), wi_ref[...],
                    preferred_element_type=jnp.float32) + bi_ref[...]
    inter = _gelu(inter)                                          # f32 epilogue
    ffn = jnp.dot(inter.astype(jnp.bfloat16), wo2_ref[...],
                  preferred_element_type=jnp.float32) + bo2_ref[...]
    o_ref[...] = _ln(ffn + h1, ln2g_ref[...], ln2b_ref[...], eps).astype(o_ref.dtype)


def encoder_layer(x, mask_add, p, cfg):
    """x: (B, S, H) bf16, mask_add: (B, 1, S) f32 additive key mask."""
    B, S, H = x.shape
    nh, dh, I = cfg["heads"], cfg["head_dim"], cfg["inter"]
    tq = _pick_tile(S, 256)
    mode = _weight_pipeline_mode()

    # 1) fused QKV projection (one GEMM, bf16 output, Q already scaled)
    qkv = qkv_proj(x.reshape(B * S, H), p["wqkv"], p["bqkv"])     # (B*S, 3H)
    # head-major relayout done once in plain XLA (outside Pallas), so every
    # in-kernel contraction is a leading-batch matmul with no in-kernel transpose
    qkv = jnp.transpose(qkv.reshape(B, S, 3, nh, dh), (2, 0, 3, 1, 4))
    q_h, k_h, v_h = qkv[0], qkv[1], qkv[2]                        # (B, nh, S, dh)

    # 2) attention + projections + LN + FFN + LN, row-tiled over queries
    kernel = functools.partial(_attn_ffn_kernel, eps=1e-12)
    return pl.pallas_call(
        kernel,
        out_shape=jax.ShapeDtypeStruct((B, S, H), jnp.bfloat16),
        grid=(B, S // tq),
        in_specs=[
            pl.BlockSpec((None, 1, S), lambda b, q: (b, 0, 0)),       # mask
            pl.BlockSpec((None, nh, tq, dh), lambda b, q: (b, 0, q, 0)),  # Q rows
            pl.BlockSpec((None, nh, S, dh), lambda b, q: (b, 0, 0, 0)),   # K (full, fetched once per batch)
            pl.BlockSpec((None, nh, S, dh), lambda b, q: (b, 0, 0, 0)),   # V
            pl.BlockSpec((None, tq, H), lambda b, q: (b, q, 0)),      # x rows (residual)
            _const_spec((nh, dh, H), mode),                           # wo (head-major)
            _const_spec((1, H), mode),                                # bo
            _const_spec((1, H), mode), _const_spec((1, H), mode),     # ln1 gamma/beta
            _const_spec((H, I), mode), _const_spec((1, I), mode),     # wi, bi
            _const_spec((I, H), mode), _const_spec((1, H), mode),     # wo2, bo2
            _const_spec((1, H), mode), _const_spec((1, H), mode),     # ln2 gamma/beta
        ],
        out_specs=pl.BlockSpec((None, tq, H), lambda b, q: (b, q, 0)),
        compiler_params=pltpu.CompilerParams(
            dimension_semantics=("parallel", "parallel"),
            vmem_limit_bytes=_vmem_limit(),
        ),
    )(mask_add, q_h, k_h, v_h, x,
      p["wo_h"], p["bo"], p["ln1_g"], p["ln1_b"],
      p["wi"], p["bi"], p["wo2"], p["bo2"], p["ln2_g"], p["ln2_b"])


# ----------------------------------------------------------------------------
# Fused pooler (dense + tanh on CLS) + classifier dense — one tiny launch
# ----------------------------------------------------------------------------
def _head_kernel(cls_ref, pw_ref, pb_ref, dw_ref, db_ref, pooled_ref, logits_ref):
    cls = cls_ref[...]                                                  # (B, H) bf16
    pooled = jnp.tanh(jnp.dot(cls, pw_ref[...],
                              preferred_element_type=jnp.float32) + pb_ref[...])
    # nn.Dropout(opt.dropout): identity in eval mode (no stochastic masking here)
    logits = jnp.dot(pooled.astype(dw_ref.dtype), dw_ref[...],
                     preferred_element_type=jnp.float32) + db_ref[...]
    pooled_ref[...] = pooled.astype(pooled_ref.dtype)
    logits_ref[...] = logits.astype(logits_ref.dtype)


def pooler_head(cls, pw, pb, dw, db):
    B, H = cls.shape
    P = dw.shape[1]
    return pl.pallas_call(
        _head_kernel,
        out_shape=(jax.ShapeDtypeStruct((B, H), jnp.float32),
                   jax.ShapeDtypeStruct((B, P), jnp.float32)),
    )(cls, pw, pb, dw, db)


# ----------------------------------------------------------------------------
# Full forward pass (embedding gathers / head-major relayout are plain-JAX glue)
# ----------------------------------------------------------------------------
def bert_base_forward(inputs, params, cfg):
    ids = inputs["text_bert_indices"]
    B, S = ids.shape
    H = cfg["hidden"]

    # embeddings: word + position + token-type (token_type_ids default to 0)
    we = jnp.take(params["word_emb"], ids, axis=0)              # (B, S, H)
    pe = params["pos_emb"][:S][None, :, :]                      # (1, S, H)
    te = params["type_emb"][0][None, None, :]                   # (1, 1, H)
    emb = (we + pe + te).reshape(B * S, H)
    x = layernorm(emb, params["emb_ln_g"], params["emb_ln_b"], out_dtype=jnp.bfloat16)
    x = x.reshape(B, S, H)

    # additive padding mask (pad id == 0), consumed inside the attention kernel
    mask_add = jnp.where(ids != 0, 0.0, -1e9).astype(jnp.float32).reshape(B, 1, S)

    for layer in params["layers"]:
        x = encoder_layer(x, mask_add, layer, cfg)

    cls = x[:, 0, :]                                            # (B, H) bf16
    pooled, logits = pooler_head(cls, params["pooler_w"], params["pooler_b"],
                                 params["dense_w"], params["dense_b"])
    return {"logits": logits, "hidden_state": pooled}


# ----------------------------------------------------------------------------
# Deterministic parameter init (kernel-ready layout: fused+scaled QKV,
# head-major Wo, bf16 GEMM weights)
# ----------------------------------------------------------------------------
def init_params(key, cfg):
    H, I, Dh, nh = cfg["hidden"], cfg["inter"], cfg["head_dim"], cfg["heads"]
    assert H == nh * Dh
    keys = iter(jax.random.split(key, 128))

    def w(shape, dtype=jnp.float32):
        return (jax.random.normal(next(keys), shape, jnp.float32) * 0.02).astype(dtype)

    params = {
        "word_emb": w((cfg["vocab"], H)),
        "pos_emb": w((cfg["max_pos"], H)),
        "type_emb": w((cfg["type_vocab"], H)),
        "emb_ln_g": jnp.ones((H,), jnp.float32),
        "emb_ln_b": jnp.zeros((H,), jnp.float32),
        "pooler_w": w((H, H), jnp.bfloat16),
        "pooler_b": jnp.zeros((1, H), jnp.float32),
        "dense_w": w((H, cfg["polarities"]), jnp.bfloat16),
        "dense_b": jnp.zeros((1, cfg["polarities"]), jnp.float32),
        "layers": [],
    }

    scale = 1.0 / math.sqrt(Dh)
    for _ in range(cfg["layers"]):
        wq, wk, wv = w((H, H)), w((H, H)), w((H, H))
        bq = jnp.zeros((H,), jnp.float32)
        bk = jnp.zeros((H,), jnp.float32)
        bv = jnp.zeros((H,), jnp.float32)
        # fuse Q/K/V into one (H, 3H) weight; fold the softmax scale into Q
        wqkv = jnp.concatenate([wq * scale, wk, wv], axis=1).astype(jnp.bfloat16)
        bqkv = jnp.concatenate([bq * scale, bk, bv]).reshape(1, 3 * H)
        wo = w((H, H))
        params["layers"].append({
            "wqkv": wqkv, "bqkv": bqkv,
            # head-major Wo: out[q,:] = sum_h ctx[h,q,:] @ wo_h[h]
            "wo_h": wo.reshape(nh, Dh, H).astype(jnp.bfloat16),
            "bo": jnp.zeros((1, H), jnp.float32),
            "ln1_g": jnp.ones((1, H), jnp.float32), "ln1_b": jnp.zeros((1, H), jnp.float32),
            "wi": w((H, I), jnp.bfloat16), "bi": jnp.zeros((1, I), jnp.float32),
            "wo2": w((I, H), jnp.bfloat16), "bo2": jnp.zeros((1, H), jnp.float32),
            "ln2_g": jnp.ones((1, H), jnp.float32), "ln2_b": jnp.zeros((1, H), jnp.float32),
        })
    return params


if __name__ == "__main__":
    cfg = dict(
        vocab=64, max_pos=16, type_vocab=2,
        hidden=32, heads=2, head_dim=16, inter=64, layers=2,
        polarities=3,
    )
    B, S = 2, 8

    key = jax.random.PRNGKey(0)
    pkey, ikey = jax.random.split(key)
    params = init_params(pkey, cfg)
    # ids in [1, vocab): no padding tokens, so the additive mask is all zeros
    ids = jax.random.randint(ikey, (B, S), 1, cfg["vocab"], dtype=jnp.int32)

    out = bert_base_forward({"text_bert_indices": ids}, params, cfg)
    jax.block_until_ready(out["logits"])
    jax.block_until_ready(out["hidden_state"])

    assert out["logits"].shape == (B, cfg["polarities"])
    assert out["hidden_state"].shape == (B, cfg["hidden"])
    assert jnp.all(jnp.isfinite(out["logits"]))
    assert jnp.all(jnp.isfinite(out["hidden_state"]))
    print("KERNEL_OK")
</pallas_src>

<mosaic_0001>
module attributes {stable_mosaic.version = 11 : i64} {
  func.func @k(%arg0: i32, %arg1: memref<8x128xf32, #tpu.memory_space<vmem>>, %arg2: memref<8x128xf32, #tpu.memory_space<vmem>>) attributes {dimension_semantics = [#tpu.dimension_semantics<arbitrary>], iteration_bounds = array<i64: 2>, scalar_prefetch = 0 : i64, scratch_operands = 0 : i64, tpu.core_type = #tpu.core_type<tc>, window_params = [{pipeline_mode = #tpu.pipeline_mode<synchronous>, transform_indices = @transform_0, window_bounds = array<i64: 8, 128>}, {transform_indices = @transform_1, window_bounds = array<i64: 8, 128>}]} {
    %c0 = arith.constant 0 : index
    %c0_0 = arith.constant 0 : index
    %0 = vector.load %arg1[%c0, %c0_0] : memref<8x128xf32, #tpu.memory_space<vmem>>, vector<8x128xf32>
    %cst = arith.constant 2.000000e+00 : f32
    %1 = vector.broadcast %cst : f32 to vector<8x128xf32>
    %2 = arith.mulf %0, %1 : vector<8x128xf32>
    %c0_1 = arith.constant 0 : index
    %c0_2 = arith.constant 0 : index
    %3 = vector.load %arg2[%c0_1, %c0_2] : memref<8x128xf32, #tpu.memory_space<vmem>>, vector<8x128xf32>
    tpu.vector_store %arg2[%c0_1, %c0_2], %2 {strides = array<i32>} : memref<8x128xf32, #tpu.memory_space<vmem>>, vector<8x128xf32>,
    return
  }
  func.func @transform_0(%arg0: i32) -> (i32, i32) {
    %c0_i32 = arith.constant 0 : i32
    %c0_i32_0 = arith.constant 0 : i32
    %c0_i32_1 = arith.constant 0 : i32
    return %c0_i32, %c0_i32_0 : i32, i32
  }
  func.func @transform_1(%arg0: i32) -> (i32, i32) {
    %c0_i32 = arith.constant 0 : i32
    %c0_i32_0 = arith.constant 0 : i32
    return %arg0, %c0_i32 : i32, i32
  }
}

module attributes {stable_mosaic.version = 11 : i64} {
  func.func @_ln_kernel(%arg0: i32, %arg1: memref<16x32xf32, #tpu.memory_space<vmem>>, %arg2: memref<1x32xf32, #tpu.memory_space<vmem>>, %arg3: memref<1x32xf32, #tpu.memory_space<vmem>>, %arg4: memref<16x32xbf16, #tpu.memory_space<vmem>>) attributes {dimension_semantics = [#tpu.dimension_semantics<parallel>], iteration_bounds = array<i64: 1>, scalar_prefetch = 0 : i64, scratch_operands = 0 : i64, tpu.core_type = #tpu.core_type<tc>, window_params = [{transform_indices = @transform_0, window_bounds = array<i64: 16, 32>}, {pipeline_mode = #tpu.pipeline_mode<synchronous>, transform_indices = @transform_1, window_bounds = array<i64: 1, 32>}, {pipeline_mode = #tpu.pipeline_mode<synchronous>, transform_indices = @transform_2, window_bounds = array<i64: 1, 32>}, {transform_indices = @transform_3, window_bounds = array<i64: 16, 32>}]} {
    %c0 = arith.constant 0 : index
    %c0_0 = arith.constant 0 : index
    %0 = vector.load %arg1[%c0, %c0_0] : memref<16x32xf32, #tpu.memory_space<vmem>>, vector<16x32xf32>
    %c0_1 = arith.constant 0 : index
    %c0_2 = arith.constant 0 : index
    %1 = vector.load %arg2[%c0_1, %c0_2] : memref<1x32xf32, #tpu.memory_space<vmem>>, vector<1x32xf32>
    %c0_3 = arith.constant 0 : index
    %c0_4 = arith.constant 0 : index
    %2 = vector.load %arg3[%c0_3, %c0_4] : memref<1x32xf32, #tpu.memory_space<vmem>>, vector<1x32xf32>
    %cst = arith.constant dense<0.000000e+00> : vector<16xf32>
    %3 = vector.multi_reduction <add>, %0, %cst [1] : vector<16x32xf32> to vector<16xf32>
    %4 = vector.shape_cast %3 : vector<16xf32> to vector<16x1xf32>
    %cst_5 = arith.constant 3.200000e+01 : f32
    %5 = vector.broadcast %cst_5 : f32 to vector<16x1xf32>
    %6 = arith.divf %4, %5 : vector<16x1xf32>
    %7 = vector.broadcast %6 : vector<16x1xf32> to vector<16x32xf32>
    %8 = arith.subf %0, %7 : vector<16x32xf32>
    %9 = arith.mulf %8, %8 : vector<16x32xf32>
    %cst_6 = arith.constant dense<0.000000e+00> : vector<16xf32>
    %10 = vector.multi_reduction <add>, %9, %cst_6 [1] : vector<16x32xf32> to vector<16xf32>
    %11 = vector.shape_cast %10 : vector<16xf32> to vector<16x1xf32>
    %cst_7 = arith.constant 3.200000e+01 : f32
    %12 = vector.broadcast %cst_7 : f32 to vector<16x1xf32>
    %13 = arith.divf %11, %12 : vector<16x1xf32>
    %14 = vector.broadcast %6 : vector<16x1xf32> to vector<16x32xf32>
    %15 = arith.subf %0, %14 : vector<16x32xf32>
    %cst_8 = arith.constant 9.99999996E-13 : f32
    %16 = vector.broadcast %cst_8 : f32 to vector<16x1xf32>
    %17 = arith.addf %13, %16 : vector<16x1xf32>
    %18 = math.rsqrt %17 : vector<16x1xf32>
    %19 = vector.broadcast %18 : vector<16x1xf32> to vector<16x32xf32>
    %20 = arith.mulf %15, %19 : vector<16x32xf32>
    %21 = vector.broadcast %1 : vector<1x32xf32> to vector<16x32xf32>
    %22 = arith.mulf %20, %21 : vector<16x32xf32>
    %23 = vector.broadcast %2 : vector<1x32xf32> to vector<16x32xf32>
    %24 = arith.addf %22, %23 : vector<16x32xf32>
    %25 = arith.truncf %24 : vector<16x32xf32> to vector<16x32xbf16>
    %c0_9 = arith.constant 0 : index
    %c0_10 = arith.constant 0 : index
    %26 = vector.load %arg4[%c0_9, %c0_10] : memref<16x32xbf16, #tpu.memory_space<vmem>>, vector<16x32xbf16>
    tpu.vector_store %arg4[%c0_9, %c0_10], %25 {strides = array<i32>} : memref<16x32xbf16, #tpu.memory_space<vmem>>, vector<16x32xbf16>,
    return
  }
  func.func @transform_0(%arg0: i32) -> (i32, i32) {
    %c0_i32 = arith.constant 0 : i32
    %c0_i32_0 = arith.constant 0 : i32
    return %arg0, %c0_i32 : i32, i32
  }
  func.func @transform_1(%arg0: i32) -> (i32, i32) {
    %c0_i32 = arith.constant 0 : i32
    %c0_i32_0 = arith.constant 0 : i32
    %c0_i32_1 = arith.constant 0 : i32
    return %c0_i32, %c0_i32_0 : i32, i32
  }
  func.func @transform_2(%arg0: i32) -> (i32, i32) {
    %c0_i32 = arith.constant 0 : i32
    %c0_i32_0 = arith.constant 0 : i32
    %c0_i32_1 = arith.constant 0 : i32
    return %c0_i32, %c0_i32_0 : i32, i32
  }
  func.func @transform_3(%arg0: i32) -> (i32, i32) {
    %c0_i32 = arith.constant 0 : i32
    %c0_i32_0 = arith.constant 0 : i32
    return %arg0, %c0_i32 : i32, i32
  }
}

</mosaic_0001>

<bundles_post_ra>
// kernel: tpu_custom_call.1
= control target key start
LH: loop header
LB: loop body
LE: loop exit
PB: predicated region body
PF: predicated region fallthrough
CT: control target
= control target key end

     0   :  { %6 = vsyncpa [#allocation3], 0  ;;  %s441_s0 = inlined_call_operand.hbm [shape: f32[16,128], index: 0, kind: input, shape index: {}]   ;;  %s442_s1 = inlined_call_operand.hbm [shape: f32[16,128], index: 1, kind: output, shape index: {}]  }
   0x1   :  { %7 = vsyncpa [#allocation4], 0 }
   0x2   :  { %9 = vsyncpa [#allocation4 + $0x1], 0  ;;  %s357_s6 = smov 0   ;;  %s359_s7 = smov 0  }
   0x3   :  { %s361_s8 = smov 0   ;;  %s363_s9 = smov 0  }
   0x4 LB: > { %s378_s10 = sadd.s32 4294967295, %s344_s9   ;;  %s188_s11 = sadd.s32 4294967294, %s344_s9   ;;  %s344_s9 = sphi %s363_s9, %s448_s9   ;;  %s340_s8 = sphi %s361_s8, %s447_s8   ;;  %s336_s7 = sphi %s359_s7, %s446_s7   ;;  %s332_s6 = sphi %s357_s6, %s445_s6  }
   0x5   : > { %s382_s12 = sadd.s32 1, %s344_s9   ;;  %s43_s13 = sadd.s32 1, %s340_s8 }
   0x6   : > { %s40_s14 = ssub.s32 %s344_s9, %s382_s12  ;;  %p53_p0 = scmp.ne.s32.totalorder %s340_s8, %s336_s7 }
   0x7   : > { %p41_p1 = scmp.eq.s32.totalorder %s40_s14, 0  ;;  %p54_p2 = scmp.eq.s32.totalorder %s378_s10, 1 }
   0x8   : > { %p59_p3 = scmp.ne.s32.totalorder %s336_s7, %s332_s6  ;;  %p60_p4 = scmp.eq.s32.totalorder %s188_s11, 1 }
   0x9   : > { %s393_s15 = scalar_select %p41_p1, %s340_s8, %s43_s13  }
   0xa   : > { %p395_p5 = por %p54_p2, %p53_p0  ;;  %p399_p6 = por %p60_p4, %p59_p3 }
   0xb   : > { %p189_p7 = scmp.ge.s32.totalorder %s344_s9, 1  ;;  %p67_p8 = scmp.lt.s32.totalorder %s344_s9, 3 }
   0xc   : > { %p212_p9 = scmp.eq.s32.totalorder %s378_s10, 0  ;;  %s79_s20 = sshll.u32 %s441_s0, 4  ;;  %s80_s20 = int_to_ptr.hbm [resolvable:$true] %s79_s20 }
   0xd   : > { %p68_p10 = pnand %p189_p7, %p67_p8  ;;  %s346_s21 = smov [#allocation2]  }
   0xe   : > { %s81_s22 = sshll.u32 %s346_s21, 4  ;;  %s82_s22 = int_to_ptr.vmem [resolvable:$true] %s81_s22 }
   0xf   : > { %p204_p11 = pneg %p68_p10  ;;  %94 = sbr.rel (%p68_p10) target bundleno = 37 (0x25), region = 24 }
  0x11   : > { %p205_p12 = pnand %p212_p9, %p204_p11 }
  0x13   : > { %207 = dma.hbm_to_vmem [thread:$0]  (!%p205_p12), %s80_s20, 128, %s82_s22, [#allocation3]  }
  0x14   : > { %323 = dma.done.wait (%p212_p9), [#allocation3], 128  }
  0x15   : > { %325 = vsyncadd (%p212_p9), [#allocation3], 4294967168  ;;  %s107_s23 = sand.u32 1, %s336_s7   ;;  %s195_s24 = sshll.u32 %s378_s10, 3  ;;  %v110_v0 = vld [vmem:[#allocation2] sm:$0xff] }
  0x16   : > { %s193_s25 = sshll.u32 %s107_s23, 3  ;;  %s124_s28 = scalar_lea.hbm %s442_s1, %s195_s24  ;;  %v111_v1 = vmul.f32 2.0, %v110_v0 }
  0x17   : > { %s109_s29 = scalar_lea.vmem [#allocation5], %s193_s25  ;;  %s128_s2 = sshll.u32 %s124_s28, 4  ;;  %s129_s2 = int_to_ptr.hbm [resolvable:$true] %s128_s2 }
  0x18   : > { %s126_s30 = sshll.u32 %s109_s29, 4  ;;  %112 = vst [vmem:[%s109_s29] sm:$0xff] %v111_v1  ;;  %s114_s3 = scalar_lea.sflag [#allocation4], %s107_s23  ;;  %s127_s30 = int_to_ptr.vmem [resolvable:$true] %s126_s30 }
  0x19   : > { %s292_s4 = sshra.s32 %s129_s2, 4  ;;  %s298_s13 = scalar_lea.hbm %s442_s1, 16  ;;  %s293_s4 = int_to_ptr.hbm [resolvable:$true] %s292_s4 }
  0x1a   : > { %s294_s5 = scalar_lea.hbm %s293_s4, 8  ;;  %p299_p2 = scmp.lt.s32.totalorder %s293_s4, %s442_s1 }
  0x1b   : > { %p295_p13 = scmp.ne.s32.totalorder %s293_s4, %s294_s5  ;;  %p300_p3 = scmp.lt.s32.totalorder %s298_s13, %s294_s5 }
  0x1d   : > { %p296_p0 = pnand %p295_p13, %p395_p5  ;;  %p301_p4 = por %p300_p3, %p299_p2 }
  0x1f   : > { %p297_p1 = pneg %p296_p0 }
  0x21   : > { %p302_p7 = pnand %p301_p4, %p297_p1 }
  0x23   : > { %305 = shalt.err (!%p302_p7)
}
  0x24   : > { %202 = dma.vmem_to_hbm [thread:$0]  (%p395_p5), %s127_s30, 128, %s129_s2, %s114_s3  }
  0x25 PF: > { %p214_p8 = scmp.ge.s32.totalorder %s344_s9, 2  ;;  %s140_s19 = sand.u32 1, %s332_s6  }
  0x26   : > { %s141_s20 = scalar_lea.sflag [#allocation4], %s140_s19 }
  0x27   : > { %p209_p9 = pnand %p214_p8, %p399_p6 }
  0x29   : > { %p210_p10 = pneg %p209_p9 }
  0x2b   : > { %327 = dma.done.wait (%p210_p10), %s141_s20, 128  }
  0x2c   : > { %329 = vsyncadd (%p210_p10), %s141_s20, 4294967168  ;;  %p12_p11 = scmp.ge.s32.totalorder %s382_s12, 4   ;;  %s445_s6 = smov %s336_s7 }
  0x2d   : > { %s446_s7 = smov %s340_s8  ;;  %s447_s8 = smov %s393_s15 }
  0x2e   : > { %s448_s9 = smov %s382_s12  ;;  %14 = sbr.rel (!%p12_p11) target bundleno = 4 (0x4), region = 61 }
  0x33   :  { %147 = vsyncpa [#allocation3], 1 }
  0x34   :  { %149 = vsyncpa [#allocation3 + $0x1], 1 }
  0x35   :  { %150 = vsyncpa [#allocation4], 1 }
  0x36   :  { %152 = vsyncpa [#allocation4 + $0x1], 1 }

// kernel: tpu_custom_call.1
= control target key start
LH: loop header
LB: loop body
LE: loop exit
PB: predicated region body
PF: predicated region fallthrough
CT: control target
= control target key end

     0   :  { %8 = vsyncpa [#allocation3], 0  ;;  %s274_s0 = inlined_call_operand.hbm [shape: f32[16,32], index: 0, kind: input, shape index: {}]   ;;  %s275_s1 = inlined_call_operand.hbm [shape: f32[1,32], index: 1, kind: input, shape index: {}]   ;;  %s276_s2 = inlined_call_operand.vmem [shape: f32[1,32], index: 2, kind: input, shape index: {}]   ;;  %s277_s3 = inlined_call_operand.hbm [shape: bf16[16,32], index: 3, kind: output, shape index: {}]  }
   0x1   :  { %9 = vsyncpa [#allocation6], 0 }
   0x2   :  { %10 = vsyncpa [#allocation4], 0  ;;  %s15_s14 = sshll.u32 %s274_s0, 4  ;;  %s230_s15 = smov [#allocation2]   ;;  %s16_s14 = int_to_ptr.hbm [resolvable:$true] %s15_s14 }
   0x3   :  { %s17_s16 = sshll.u32 %s230_s15, 4  ;;  %s29_s19 = sshll.u32 %s275_s1, 4  ;;  %s18_s16 = int_to_ptr.vmem [resolvable:$true] %s17_s16  ;;  %s30_s19 = int_to_ptr.hbm [resolvable:$true] %s29_s19 }
   0x4   :  { %s231_s20 = smov 128   ;;  %s232_s21 = smov 8  }
   0x5   :  { %23 = dma.hbm_to_vmem [thread:$0]  %s16_s14, 256, %s18_s16, [#allocation3], %s231_s20, %s231_s20, %s232_s21  }
   0x6   :  { %s233_s22 = smov [#allocation5]  }
   0x7   :  { %s31_s23 = sshll.u32 %s233_s22, 4  ;;  %s32_s23 = int_to_ptr.vmem [resolvable:$true] %s31_s23 }
   0x8   :  { %34 = dma.hbm_to_vmem [thread:$0]  %s30_s19, 16, %s32_s23, [#allocation6]  }
   0x9   :  { %224 = dma.done.wait [#allocation3], 256  }
   0xa   :  { %225 = vsyncadd [#allocation3], 4294967040 }
   0xb   :  { %226 = dma.done.wait [#allocation6], 16  }
   0xc   :  { %227 = vsyncadd [#allocation6], 4294967280  ;;  %vm49_vm0 = vcmask 261120   ;;  %v45_v0 = vld [vmem:[#allocation2] sm:$0xff]  ;;  %v46_v2 = vld [vmem:[#allocation2 + $0x8] sm:$0xff]  ;;  %v234_v4 = vmov 32.0  }
   0xd   :  { %v50_v1 = vsel %vm49_vm0, %v45_v0, 0.0  ;;  %v53_v3 = vsel %vm49_vm0, %v46_v2, 0.0  ;;  %146 = vrcp.f32 %v234_v4  ;;  %v144_v35 = vld [vmem:[#allocation5] ss:$0 sm:$0xff]  ;;  %v145_v38 = vld [vmem:[%s276_s2] ss:$0 sm:$0xff] }
   0xe   :  { %51 = vadd.xlane.f32.xlu0 %v50_v1  ;;  %vm113_vm7 = vcmask 257024   ;;  %s235_s24 = smov [#allocation7]   ;;  %s122_s2 = sshll.u32 %s277_s3, 4  ;;  %s123_s2 = int_to_ptr.hbm [resolvable:$true] %s122_s2 }
   0xf   :  { %s120_s25 = sshll.u32 %s235_s24, 4  ;;  %s236_s28 = smov 64   ;;  %s121_s25 = int_to_ptr.vmem [resolvable:$true] %s120_s25 }
  0x10   :  { %s237_s29 = smov 4  }
  0x13   :  { %v147_v5 = vpop.eup %146 }
  0x14   :  { %v57_v6 = vmul.f32 32.0, %v147_v5  ;;  %vm61_vm1 = vweird.f32 %v147_v5 }
  0x16   :  { %54 = vadd.xlane.f32.xlu0 %v53_v3  ;;  %v58_v7 = vsub.f32 1.0, %v57_v6 }
  0x18   :  { %v59_v8 = vmul.f32 %v147_v5, %v58_v7 }
  0x1a   :  { %v60_v9 = vadd.f32 %v147_v5, %v59_v8 }
  0x1c   :  { %v62_v10 = vsel %vm61_vm1, %v147_v5, %v60_v9 }
  0x81   :  { %v52_v11 = vpop.xlane.xlu0 %51 }
  0x82   :  { %v63_v12 = vmul.f32 %v62_v10, %v52_v11 }
  0x84   :  { %v65_v13 = vsub.f32 %v45_v0, %v63_v12 }
  0x86   :  { %v67_v14 = vmul.f32 %v65_v13, %v65_v13 }
  0x88   :  { %v69_v15 = vsel %vm49_vm0, %v67_v14, 0.0 }
  0x89   :  { %70 = vadd.xlane.f32.xlu1 %v69_v15  ;;  %v55_v16 = vpop.xlane.xlu0 %54 }
  0x8a   :  { %v64_v17 = vmul.f32 %v62_v10, %v55_v16 }
  0x8c   :  { %v66_v18 = vsub.f32 %v46_v2, %v64_v17 }
  0x8e   :  { %v68_v19 = vmul.f32 %v66_v18, %v66_v18 }
  0x90   :  { %v72_v20 = vsel %vm49_vm0, %v68_v19, 0.0 }
  0x91   :  { %73 = vadd.xlane.f32.xlu1 %v72_v20 }
  0xfc   :  { %v71_v21 = vpop.xlane.xlu1 %70 }
  0xfd   :  { %v75_v22 = vmul.f32 %v71_v21, %v62_v10 }
  0xff   :  { %v77_v23 = vadd.f32 1e-12, %v75_v22 }
 0x101   :  { %148 = vrsqrt.f32 %v77_v23  ;;  %vm85_vm3 = vweird.f32 %v77_v23 }
 0x104   :  { %v74_v24 = vpop.xlane.xlu1 %73 }
 0x105   :  { %v76_v25 = vmul.f32 %v74_v24, %v62_v10 }
 0x107   :  { %v149_v26 = vpop.eup %148  ;;  %v78_v27 = vadd.f32 1e-12, %v76_v25 }
 0x108   :  { %v80_v28 = vmul.f32 %v149_v26, %v77_v23  ;;  %vm86_vm2 = vweird.f32 %v149_v26 }
 0x109   :  { %150 = vrsqrt.f32 %v78_v27  ;;  %vm87_vm4 = vmor %vm85_vm3, %vm86_vm2  ;;  %vm95_vm6 = vweird.f32 %v78_v27 }
 0x10a   :  { %v81_v29 = vmul.f32 %v149_v26, %v80_v28 }
 0x10c   :  { %v82_v30 = vmul.f32 0.5, %v81_v29 }
 0x10e   :  { %v83_v31 = vsub.f32 1.5, %v82_v30 }
 0x10f   :  { %v151_v32 = vpop.eup %150 }
 0x110   :  { %v84_v33 = vmul.f32 %v149_v26, %v83_v31  ;;  %v90_v34 = vmul.f32 %v151_v32, %v78_v27  ;;  %vm96_vm5 = vweird.f32 %v151_v32 }
 0x111   :  { %vm97_vm8 = vmor %vm95_vm6, %vm96_vm5 }
 0x112   :  { %v88_v36 = vsel %vm87_vm4, %v149_v26, %v84_v33  ;;  %v91_v37 = vmul.f32 %v151_v32, %v90_v34 }
 0x113   :  { %v99_v39 = vmul.f32 %v88_v36, %v65_v13 }
 0x114   :  { %v92_v40 = vmul.f32 0.5, %v91_v37 }
 0x115   :  { %v104_v41 = vmul.f32 %v144_v35, %v99_v39 }
 0x116   :  { %v93_v42 = vsub.f32 1.5, %v92_v40 }
 0x117   :  { %v109_v43 = vadd.f32 %v145_v38, %v104_v41 }
 0x118   :  { %v94_v44 = vmul.f32 %v151_v32, %v93_v42 }
 0x119   :  { %v111_v45 = vpack.c.bf16 %v109_v43, %v109_v43 }
 0x11a   :  { %v98_v46 = vsel %vm97_vm8, %v151_v32, %v94_v44 }
 0x11b   :  { %v100_v47 = vmul.f32 %v98_v46, %v66_v18  ;;  %114 = vst.msk [vmem:[#allocation7] sm:$0xf] %vm113_vm7, %v111_v45 }
 0x11d   :  { %v105_v48 = vmul.f32 %v144_v35, %v100_v47 }
 0x11f   :  { %v110_v49 = vadd.f32 %v145_v38, %v105_v48 }
 0x121   :  { %v112_v50 = vpack.c.bf16 %v110_v49, %v110_v49 }
 0x123   :  { %115 = vst.msk [vmem:[#allocation7 + $0x4] sm:$0xf] %vm113_vm7, %v112_v50 }
 0x124   :  { %128 = dma.vmem_to_hbm [thread:$0]  %s121_s25, 128, %s123_s2, [#allocation4], %s236_s28, %s236_s28, %s237_s29  }
 0x125   :  { %228 = dma.done.wait [#allocation4], 128  }
 0x126   :  { %229 = vsyncadd [#allocation4], 4294967168 }
 0x127   :  { %133 = vsyncpa [#allocation3], 1 }
 0x128   :  { %134 = vsyncpa [#allocation6], 1 }
 0x129   :  { %135 = vsyncpa [#allocation4], 1 }

</bundles_post_ra>
